<compile_context>
chip_gen: v7x
topology: tpu7x:2x2x1
jax: 0.10.0
libtpu: 0.0.40
codegen_flags: <defaults>
</compile_context>

<pallas_src>
import jax
import jax.numpy as jnp
from jax.experimental import pallas as pl
from jax.experimental.pallas import tpu as pltpu

_LANE = 128                               # lane-dense width -> unmasked vld/vst
_TILE_BYTES = 4 * 1024 * 1024             # per-buffer VMEM budget (4 MiB)
_VMEM_LIMIT_BYTES = 32 * 1024 * 1024      # raises v5e's 16 MiB scoped default
_MAX_UNALIGNED_BLOCK_BYTES = 6 * 1024 * 1024  # guard for huge, non-128-multiple last dims


def _scale_kernel(inv_t_ref, x_ref, o_ref):
    # inv_t_ref: (1, 1) f32 scalar in SMEM; x_ref / o_ref: (tile_rows, cols) VMEM tiles.
    o_ref[...] = (x_ref[...].astype(jnp.float32) * inv_t_ref[0, 0]).astype(o_ref.dtype)


def _sublane_pack(dtype) -> int:
    # Rows per packed sublane group: 8 for 4-byte, 16 for 2-byte, 32 for 1-byte dtypes.
    return max(8, 32 // jnp.dtype(dtype).itemsize)


def _pick_tile_rows(total_rows: int, row_bytes: int, pack: int) -> int:
    """Row-tile size: byte-budgeted, multiple of `pack` (or the full dim)."""
    budget_rows = max(pack, (_TILE_BYTES // max(row_bytes, 1)) // pack * pack)
    if total_rows > budget_rows:
        return budget_rows                       # >= 2 grid steps automatically
    if total_rows >= 2 * pack:
        # Split into >= 2 blocks so the "parallel" grid axis can shard across
        # v7x's two TensorCores (no effect on single-TC v5e/v6e).
        half = -(-total_rows // 2)
        return -(-half // pack) * pack
    return total_rows                            # full dim (allowed even if < pack)


def _run_2d(x2: jax.Array, inv_t: jax.Array, tile_rows: int) -> jax.Array:
    rows, cols = x2.shape
    grid = (pl.cdiv(rows, tile_rows),)
    return pl.pallas_call(
        _scale_kernel,
        out_shape=jax.ShapeDtypeStruct((rows, cols), x2.dtype),
        grid=grid,
        in_specs=[
            pl.BlockSpec((1, 1), lambda i: (0, 0), memory_space=pltpu.SMEM),
            pl.BlockSpec((tile_rows, cols), lambda i: (i, 0)),
        ],
        out_specs=pl.BlockSpec((tile_rows, cols), lambda i: (i, 0)),
        compiler_params=pltpu.CompilerParams(
            dimension_semantics=("parallel",),
            vmem_limit_bytes=_VMEM_LIMIT_BYTES,
        ),
    )(inv_t, x2)


def calibrate(logits: jax.Array, temperature: jax.Array) -> jax.Array:
    """Computes logits / temperature with a batch-tiled Pallas TPU kernel."""
    orig_shape = logits.shape
    dtype = logits.dtype
    n = logits.size
    itemsize = jnp.dtype(dtype).itemsize
    pack = _sublane_pack(dtype)

    if n == 0:
        return logits

    # Reciprocal once in the wrapper (f32, precision preserved even for bf16 logits),
    # so the kernel body is a single broadcast multiply.
    t_scalar = jnp.asarray(temperature, jnp.float32).reshape(-1)[0]
    inv_t = jnp.reshape(1.0 / t_scalar, (1, 1))

    if n % _LANE == 0:
        # Lane-dense path: row-major flatten (free) -> (rows, 128); every load/store
        # is a full-width unmasked vreg op regardless of the class-axis size.
        rows = n // _LANE
        x2 = logits.reshape(rows, _LANE)
        tile_rows = _pick_tile_rows(rows, _LANE * itemsize, pack)
        return _run_2d(x2, inv_t, tile_rows).reshape(orig_shape)

    # Unaligned element count: keep the natural (rows, last_dim) layout with a
    # full-last-dim block (masked stores) -- no pad / slice HBM passes.
    cols = orig_shape[-1] if logits.ndim >= 2 else n
    rows = n // cols
    row_bytes = cols * itemsize
    if row_bytes * pack > _MAX_UNALIGNED_BLOCK_BYTES:
        # TODO(synk): pathological case (huge, non-128-multiple last dim) where even a
        # minimum-height block exceeds the VMEM budget; handled by a plain XLA divide.
        return (logits.astype(jnp.float32) / t_scalar).astype(dtype)

    x2 = logits.reshape(rows, cols)
    tile_rows = _pick_tile_rows(rows, row_bytes, pack)
    return _run_2d(x2, inv_t, tile_rows).reshape(orig_shape)


if __name__ == "__main__":
    key = jax.random.PRNGKey(0)

    # Deterministic parameter init matching torch.nn.Parameter(torch.ones(1) * 1.5).
    temperature = jnp.ones((1,), dtype=jnp.float32) * 1.5

    # Primary check: classification-style logits, element count multiple of 128
    # (lane-dense flattened path).
    logits = jax.random.normal(key, (8, 16), dtype=jnp.float32)
    out = calibrate(logits, temperature)
    jax.block_until_ready(out)
    ref = logits / temperature
    assert out.shape == ref.shape and out.dtype == ref.dtype
    assert jnp.allclose(out, ref, rtol=1e-6, atol=1e-6), "mismatch (8x16)"

    # Unaligned element count (6*10 = 60): (rows, C) masked-store path, no pad/slice copies.
    k1, k2 = jax.random.split(jax.random.PRNGKey(1))
    logits2 = jax.random.normal(k1, (6, 10), dtype=jnp.float32)
    out2 = calibrate(logits2, temperature)
    jax.block_until_ready(out2)
    assert jnp.allclose(out2, logits2 / temperature, rtol=1e-6, atol=1e-6), "mismatch (6x10)"

    # Larger unaligned case: >= 2 grid steps (v7x megacore sharding), full-C blocks.
    logits3 = jax.random.normal(k2, (250, 1000), dtype=jnp.float32)
    out3 = calibrate(logits3, temperature)
    jax.block_until_ready(out3)
    assert jnp.allclose(out3, logits3 / temperature, rtol=1e-6, atol=1e-6), "mismatch (250x1000)"

    # Larger aligned case: multi-step lane-dense grid.
    logits4 = jax.random.normal(jax.random.PRNGKey(2), (512, 256), dtype=jnp.float32)
    out4 = calibrate(logits4, temperature)
    jax.block_until_ready(out4)
    assert jnp.allclose(out4, logits4 / temperature, rtol=1e-6, atol=1e-6), "mismatch (512x256)"

    print("KERNEL_OK")
</pallas_src>

<mosaic_0001>
module attributes {stable_mosaic.version = 11 : i64} {
  func.func @_scale_kernel(%arg0: i32, %arg1: memref<1x1xf32, #tpu.memory_space<smem>>, %arg2: memref<1x128xf32, #tpu.memory_space<vmem>>, %arg3: memref<1x128xf32, #tpu.memory_space<vmem>>) attributes {dimension_semantics = [#tpu.dimension_semantics<parallel>], iteration_bounds = array<i64: 1>, scalar_prefetch = 0 : i64, scratch_operands = 0 : i64, tpu.core_type = #tpu.core_type<tc>, window_params = [{transform_indices = @transform_0, window_bounds = array<i64: 1, 1>}, {transform_indices = @transform_1, window_bounds = array<i64: 1, 128>}, {transform_indices = @transform_2, window_bounds = array<i64: 1, 128>}]} {
    %c0 = arith.constant 0 : index
    %c0_0 = arith.constant 0 : index
    %0 = vector.load %arg2[%c0, %c0_0] : memref<1x128xf32, #tpu.memory_space<vmem>>, vector<1x128xf32>
    %c0_1 = arith.constant 0 : index
    %c0_2 = arith.constant 0 : index
    %1 = memref.load %arg1[%c0_1, %c0_2] : memref<1x1xf32, #tpu.memory_space<smem>>
    %2 = vector.broadcast %1 : f32 to vector<1x128xf32>
    %3 = arith.mulf %0, %2 : vector<1x128xf32>
    %c0_3 = arith.constant 0 : index
    %c0_4 = arith.constant 0 : index
    %4 = vector.load %arg3[%c0_3, %c0_4] : memref<1x128xf32, #tpu.memory_space<vmem>>, vector<1x128xf32>
    tpu.vector_store %arg3[%c0_3, %c0_4], %3 {strides = array<i32>} : memref<1x128xf32, #tpu.memory_space<vmem>>, vector<1x128xf32>,
    return
  }
  func.func @transform_0(%arg0: i32) -> (i32, i32) {
    %c0_i32 = arith.constant 0 : i32
    %c0_i32_0 = arith.constant 0 : i32
    %c0_i32_1 = arith.constant 0 : i32
    return %c0_i32, %c0_i32_0 : i32, i32
  }
  func.func @transform_1(%arg0: i32) -> (i32, i32) {
    %c0_i32 = arith.constant 0 : i32
    %c0_i32_0 = arith.constant 0 : i32
    return %arg0, %c0_i32 : i32, i32
  }
  func.func @transform_2(%arg0: i32) -> (i32, i32) {
    %c0_i32 = arith.constant 0 : i32
    %c0_i32_0 = arith.constant 0 : i32
    return %arg0, %c0_i32 : i32, i32
  }
}

</mosaic_0001>

<bundles_post_ra>
// kernel: tpu_custom_call.1
= control target key start
LH: loop header
LB: loop body
LE: loop exit
PB: predicated region body
PF: predicated region fallthrough
CT: control target
= control target key end

     0   :  { %s91_s0 = inlined_call_operand.<no memory space> [shape: f32[1,1], index: 0, kind: input, shape index: {}]   ;;  %s92_s1 = inlined_call_operand.vmem [shape: f32[1,128], index: 1, kind: input, shape index: {}]   ;;  %s93_s2 = inlined_call_operand.hbm [shape: f32[1,128], index: 2, kind: output, shape index: {}]  }
   0x1   :  { %v13_v0 = vld [vmem:[%s92_s1] sm:$0x1]  ;;  %v15_v1 = vstv %s91_s0 }
   0x2   :  { %8 = vsyncpa [#allocation4], 0  ;;  %v16_v2 = vmul.f32 %v15_v1, %v13_v0  ;;  %s57_s13 = smov [#allocation3]  }
   0x3   :  { %s24_s14 = sshll.u32 %s57_s13, 4  ;;  %s25_s14 = int_to_ptr.vmem [resolvable:$true] %s24_s14 }
   0x4   :  { %17 = vst [vmem:[#allocation3] sm:$0x1] %v16_v2  ;;  %s33_s15 = scalar_lea.vmem %s25_s14, 16  ;;  %s37_s16 = scalar_lea.vmem %s25_s14, 32 }
   0x5   :  { %p34_p0 = scmp.ne.s32.totalorder %s25_s14, %s33_s15  ;;  %p38_p1 = scmp.lt.s32.totalorder %s25_s14, %s25_s14 }
   0x6   :  { %p39_p2 = scmp.lt.s32.totalorder %s37_s16, %s33_s15 }
   0x8   :  { %p40_p3 = por %p39_p2, %p38_p1 }
   0xa   :  { %p41_p4 = pnand %p40_p3, %p34_p0 }
   0xc   :  { %44 = shalt.err (!%p41_p4)
}
   0xd   :  { %s45_s18 = scalar_lea.hbm %s93_s2, 16 }
   0xe   :  { %p46_p5 = scmp.ne.s32.totalorder %s93_s2, %s45_s18  ;;  %p49_p6 = scmp.lt.u32.totalorder %s45_s18, %s93_s2 }
  0x10   :  { %p51_p7 = pnand %p49_p6, %p46_p5 }
  0x12   :  { %54 = shalt.err (!%p51_p7)
}
  0x13   :  { %27 = dma.vmem_to_hbm [thread:$0]  %s25_s14, 16, %s93_s2, [#allocation4]  }
  0x14   :  { %55 = dma.done.wait [#allocation4], 16  }
  0x15   :  { %56 = vsyncadd [#allocation4], 4294967280 }
  0x16   :  { %31 = vsyncpa [#allocation4], 1 }

</bundles_post_ra>
